<compile_context>
chip_gen: v7x
topology: tpu7x:2x2x1
jax: 0.10.0
libtpu: 0.0.40
codegen_flags: <defaults>
</compile_context>

<pallas_src>
import functools

import jax
import jax.numpy as jnp
from jax.experimental import pallas as pl
from jax.experimental.pallas import tpu as pltpu


# ----------------------------------------------------------------------------
# helpers
# ----------------------------------------------------------------------------
def _leaky_relu(x, negative_slope=0.2):
    return jnp.where(x > 0, x, negative_slope * x)


def _round_up(n, m):
    return ((n + m - 1) // m) * m


def _block_diag2(a, b):
    za = jnp.zeros((a.shape[0], b.shape[1]), a.dtype)
    zb = jnp.zeros((b.shape[0], a.shape[1]), b.dtype)
    return jnp.concatenate(
        [jnp.concatenate([a, za], axis=1),
         jnp.concatenate([zb, b], axis=1)],
        axis=0,
    )


def _pack_st_params(s_p, t_p):
    """Fuse the s- and t-conditioner MLPs into one weight-packed MLP."""
    w1s, b1s, w2s, b2s, w3s, b3s, w4s, b4s = s_p
    w1t, b1t, w2t, b2t, w3t, b3t, w4t, b4t = t_p
    W1 = jnp.concatenate([w1s, w1t], axis=1)        # (d2, 2*nh)
    B1 = jnp.concatenate([b1s, b1t], axis=1)        # (1, 2*nh)
    W2 = _block_diag2(w2s, w2t)                     # (2*nh, 2*nh)
    B2 = jnp.concatenate([b2s, b2t], axis=1)
    W3 = _block_diag2(w3s, w3t)
    B3 = jnp.concatenate([b3s, b3t], axis=1)
    W4 = _block_diag2(w4s, w4t)                     # (2*nh, 2*d2)
    B4 = jnp.concatenate([b4s, b4t], axis=1)        # (1, 2*d2)
    return W1, B1, W2, B2, W3, B3, W4, B4


# ----------------------------------------------------------------------------
# kernel
# ----------------------------------------------------------------------------
def affine_full_flow_kernel(x01_ref, w1_ref, b1_ref, w2_ref, b2_ref,
                            w3_ref, b3_ref, w4_ref, b4_ref,
                            scale0_ref, shift0_ref, sum_s0_ref,
                            z_ref, ld_ref, *, d2, parity):
    x01 = x01_ref[...]                 # (TILE_B, 2*d2) = [x0 | x1]
    x0 = x01[:, :d2]
    x1 = x01[:, d2:]

    # fused s/t conditioner: one 4-layer MLP producing [s | t]
    h = _leaky_relu(jnp.dot(x0, w1_ref[...],
                            preferred_element_type=jnp.float32) + b1_ref[...])
    h = _leaky_relu(jnp.dot(h, w2_ref[...],
                            preferred_element_type=jnp.float32) + b2_ref[...])
    h = _leaky_relu(jnp.dot(h, w3_ref[...],
                            preferred_element_type=jnp.float32) + b3_ref[...])
    st = jnp.dot(h, w4_ref[...],
                 preferred_element_type=jnp.float32) + b4_ref[...]
    s = st[:, :d2]
    t = st[:, d2:]

    # constant (hoisted) conditioner on the first half, broadcast over batch
    z0 = scale0_ref[...] * x0 + shift0_ref[...]     # exp(s0)*x0 + t0
    z1 = jnp.exp(s) * x1 + t

    if parity:
        z_ref[...] = jnp.concatenate([z1, z0], axis=1)
    else:
        z_ref[...] = jnp.concatenate([z0, z1], axis=1)

    ld_ref[...] = jnp.sum(s, axis=1, keepdims=True) + sum_s0_ref[...]


# ----------------------------------------------------------------------------
# wrapper
# ----------------------------------------------------------------------------
def affine_full_flow(x, params, parity, *, tile_b_max=512):
    """Forward pass of AffineFullFlow. Returns (z, log_det)."""
    B, dim = x.shape
    d2 = dim // 2

    # de-interleave once, pack into a single lane-dense block [x0 | x1]
    x0 = x[:, 0::2]
    x1 = x[:, 1::2]
    if parity:
        x0, x1 = x1, x0
    x01 = jnp.concatenate([x0, x1], axis=1)         # (B, dim)

    # hoisted constant conditioners: input is all-ones -> batch independent
    ones = jnp.ones((1, d2), jnp.float32)
    s0 = _mlp_ref(ones, params["s0"])               # (1, d2)
    t0 = _mlp_ref(ones, params["t0"])               # (1, d2)
    scale0 = jnp.exp(s0)
    sum_s0 = jnp.sum(s0).reshape(1, 1)

    W1, B1, W2, B2, W3, B3, W4, B4 = _pack_st_params(params["s"], params["t"])
    nh2 = W2.shape[0]

    # batch tiling (pad batch to a multiple of the tile; tile is multiple of 8)
    if B <= tile_b_max:
        tile_b = _round_up(B, 8)
    else:
        tile_b = tile_b_max
    b_pad = _round_up(B, tile_b)
    if b_pad != B:
        x01 = jnp.pad(x01, ((0, b_pad - B), (0, 0)))

    def _full(shp):
        return pl.BlockSpec(shp, lambda i: (0, 0))

    in_specs = [
        pl.BlockSpec((tile_b, dim), lambda i: (i, 0)),   # x01 (tiled over batch)
        _full((d2, nh2)), _full((1, nh2)),               # W1, B1
        _full((nh2, nh2)), _full((1, nh2)),              # W2, B2
        _full((nh2, nh2)), _full((1, nh2)),              # W3, B3
        _full((nh2, dim)), _full((1, dim)),              # W4, B4
        _full((1, d2)), _full((1, d2)),                  # exp(s0), t0
        _full((1, 1)),                                   # sum(s0)
    ]
    out_specs = (
        pl.BlockSpec((tile_b, dim), lambda i: (i, 0)),   # z
        pl.BlockSpec((tile_b, 1), lambda i: (i, 0)),     # log_det (2-D in kernel)
    )
    out_shape = (
        jax.ShapeDtypeStruct((b_pad, dim), jnp.float32),
        jax.ShapeDtypeStruct((b_pad, 1), jnp.float32),
    )

    kernel = functools.partial(affine_full_flow_kernel, d2=d2,
                               parity=bool(parity))
    z, ld = pl.pallas_call(
        kernel,
        out_shape=out_shape,
        grid=(b_pad // tile_b,),
        in_specs=in_specs,
        out_specs=out_specs,
        compiler_params=pltpu.CompilerParams(
            dimension_semantics=("parallel",)),
    )(x01, W1, B1, W2, B2, W3, B3, W4, B4, scale0, t0, sum_s0)

    return z[:B], ld[:B, 0]


# ----------------------------------------------------------------------------
# init + pure-JAX reference (for the correctness check)
# ----------------------------------------------------------------------------
def _init_linear(key, nin, nout):
    # Deterministic uniform init ~ U(-1/sqrt(nin), 1/sqrt(nin)), like torch Linear.
    kw, kb = jax.random.split(key)
    bound = 1.0 / jnp.sqrt(jnp.float32(nin))
    w = jax.random.uniform(kw, (nin, nout), jnp.float32, -bound, bound)
    b = jax.random.uniform(kb, (1, nout), jnp.float32, -bound, bound)
    return w, b


def _init_mlp(key, nin, nout, nh):
    keys = jax.random.split(key, 4)
    w1, b1 = _init_linear(keys[0], nin, nh)
    w2, b2 = _init_linear(keys[1], nh, nh)
    w3, b3 = _init_linear(keys[2], nh, nh)
    w4, b4 = _init_linear(keys[3], nh, nout)
    return [w1, b1, w2, b2, w3, b3, w4, b4]


def _mlp_ref(x, p):
    w1, b1, w2, b2, w3, b3, w4, b4 = p
    h = _leaky_relu(x @ w1 + b1)
    h = _leaky_relu(h @ w2 + b2)
    h = _leaky_relu(h @ w3 + b3)
    return h @ w4 + b4


def _reference(x, params, parity):
    x0, x1 = x[:, 0::2], x[:, 1::2]
    if parity:
        x0, x1 = x1, x0
    ones = jnp.ones_like(x0)
    s, t = _mlp_ref(x0, params["s"]), _mlp_ref(x0, params["t"])
    s0, t0 = _mlp_ref(ones, params["s0"]), _mlp_ref(ones, params["t0"])
    z0 = jnp.exp(s0) * x0 + t0
    z1 = jnp.exp(s) * x1 + t
    if parity:
        z0, z1 = z1, z0
    z = jnp.concatenate([z0, z1], axis=1)
    log_det = jnp.sum(s, axis=1) + jnp.sum(s0, axis=1)
    return z, log_det


# ----------------------------------------------------------------------------
if __name__ == "__main__":
    DIM, NH = 8, 24
    d2 = DIM // 2

    root = jax.random.PRNGKey(0)
    kx, ks, kt, ks0, kt0, kx2 = jax.random.split(root, 6)

    params = {
        "s":  _init_mlp(ks,  d2, d2, NH),   # s_cond  = MLP(dim//2, dim//2, nh)
        "t":  _init_mlp(kt,  d2, d2, NH),   # t_cond  = MLP(dim//2, dim//2, nh)
        "s0": _init_mlp(ks0, d2, d2, 1),    # s_cond0 = MLP(dim//2, dim//2, 1)
        "t0": _init_mlp(kt0, d2, d2, 1),    # t_cond0 = MLP(dim//2, dim//2, 1)
    }

    # small batch, parity=0, single tile
    B0 = 8
    x = jax.random.normal(kx, (B0, DIM), jnp.float32)
    z, log_det = affine_full_flow(x, params, 0)
    jax.block_until_ready((z, log_det))
    z_ref, ld_ref = _reference(x, params, 0)
    assert jnp.allclose(z, z_ref, atol=1e-5, rtol=1e-5)
    assert jnp.allclose(log_det, ld_ref, atol=1e-5, rtol=1e-5)

    # larger batch, parity=1, exercises batch grid + padding path
    B1 = 1200
    x_big = jax.random.normal(kx2, (B1, DIM), jnp.float32)
    z_b, ld_b = affine_full_flow(x_big, params, 1)
    jax.block_until_ready((z_b, ld_b))
    z_b_ref, ld_b_ref = _reference(x_big, params, 1)
    assert jnp.allclose(z_b, z_b_ref, atol=1e-5, rtol=1e-5)
    assert jnp.allclose(ld_b, ld_b_ref, atol=1e-5, rtol=1e-5)

    print("KERNEL_OK")
</pallas_src>

<mosaic_0001>
module attributes {stable_mosaic.version = 11 : i64} {
  func.func @affine_full_flow_kernel(%arg0: i32, %arg1: memref<8x8xf32, #tpu.memory_space<vmem>>, %arg2: memref<4x48xf32, #tpu.memory_space<vmem>>, %arg3: memref<1x48xf32, #tpu.memory_space<vmem>>, %arg4: memref<48x48xf32, #tpu.memory_space<vmem>>, %arg5: memref<1x48xf32, #tpu.memory_space<vmem>>, %arg6: memref<48x48xf32, #tpu.memory_space<vmem>>, %arg7: memref<1x48xf32, #tpu.memory_space<vmem>>, %arg8: memref<48x8xf32, #tpu.memory_space<vmem>>, %arg9: memref<1x8xf32, #tpu.memory_space<vmem>>, %arg10: memref<1x4xf32, #tpu.memory_space<vmem>>, %arg11: memref<1x4xf32, #tpu.memory_space<vmem>>, %arg12: memref<1x1xf32, #tpu.memory_space<vmem>>, %arg13: memref<8x8xf32, #tpu.memory_space<vmem>>, %arg14: memref<8x1xf32, #tpu.memory_space<vmem>>) attributes {dimension_semantics = [#tpu.dimension_semantics<parallel>], iteration_bounds = array<i64: 1>, scalar_prefetch = 0 : i64, scratch_operands = 0 : i64, tpu.core_type = #tpu.core_type<tc>, window_params = [{transform_indices = @transform_0, window_bounds = array<i64: 8, 8>}, {pipeline_mode = #tpu.pipeline_mode<synchronous>, transform_indices = @transform_1, window_bounds = array<i64: 4, 48>}, {pipeline_mode = #tpu.pipeline_mode<synchronous>, transform_indices = @transform_2, window_bounds = array<i64: 1, 48>}, {pipeline_mode = #tpu.pipeline_mode<synchronous>, transform_indices = @transform_3, window_bounds = array<i64: 48, 48>}, {pipeline_mode = #tpu.pipeline_mode<synchronous>, transform_indices = @transform_4, window_bounds = array<i64: 1, 48>}, {pipeline_mode = #tpu.pipeline_mode<synchronous>, transform_indices = @transform_5, window_bounds = array<i64: 48, 48>}, {pipeline_mode = #tpu.pipeline_mode<synchronous>, transform_indices = @transform_6, window_bounds = array<i64: 1, 48>}, {pipeline_mode = #tpu.pipeline_mode<synchronous>, transform_indices = @transform_7, window_bounds = array<i64: 48, 8>}, {pipeline_mode = #tpu.pipeline_mode<synchronous>, transform_indices = @transform_8, window_bounds = array<i64: 1, 8>}, {pipeline_mode = #tpu.pipeline_mode<synchronous>, transform_indices = @transform_9, window_bounds = array<i64: 1, 4>}, {pipeline_mode = #tpu.pipeline_mode<synchronous>, transform_indices = @transform_10, window_bounds = array<i64: 1, 4>}, {pipeline_mode = #tpu.pipeline_mode<synchronous>, transform_indices = @transform_11, window_bounds = array<i64: 1, 1>}, {transform_indices = @transform_12, window_bounds = array<i64: 8, 8>}, {transform_indices = @transform_13, window_bounds = array<i64: 8, 1>}]} {
    %c0 = arith.constant 0 : index
    %c0_0 = arith.constant 0 : index
    %0 = vector.load %arg1[%c0, %c0_0] : memref<8x8xf32, #tpu.memory_space<vmem>>, vector<8x8xf32>
    %1 = vector.extract_strided_slice %0 {offsets = [0, 0], sizes = [8, 4], strides = [1, 1]} : vector<8x8xf32> to vector<8x4xf32>
    %2 = vector.extract_strided_slice %0 {offsets = [0, 4], sizes = [8, 4], strides = [1, 1]} : vector<8x8xf32> to vector<8x4xf32>
    %c0_1 = arith.constant 0 : index
    %c0_2 = arith.constant 0 : index
    %3 = vector.load %arg2[%c0_1, %c0_2] : memref<4x48xf32, #tpu.memory_space<vmem>>, vector<4x48xf32>
    %cst = arith.constant dense<0.000000e+00> : vector<8x48xf32>
    %4 = tpu.matmul %1, %3, %cst {dimension_numbers = #tpu.dot_dimension_numbers<[1], [0], [0], [1], [0, 0, 1, 1], [], []>} : vector<8x4xf32>, vector<4x48xf32>, vector<8x48xf32> -> vector<8x48xf32>
    %c0_3 = arith.constant 0 : index
    %c0_4 = arith.constant 0 : index
    %5 = vector.load %arg3[%c0_3, %c0_4] : memref<1x48xf32, #tpu.memory_space<vmem>>, vector<1x48xf32>
    %6 = vector.broadcast %5 : vector<1x48xf32> to vector<8x48xf32>
    %7 = arith.addf %4, %6 : vector<8x48xf32>
    %cst_5 = arith.constant 0.000000e+00 : f32
    %8 = vector.broadcast %cst_5 : f32 to vector<8x48xf32>
    %9 = arith.cmpf ogt, %7, %8 : vector<8x48xf32>
    %cst_6 = arith.constant 2.000000e-01 : f32
    %10 = vector.broadcast %cst_6 : f32 to vector<8x48xf32>
    %11 = arith.mulf %10, %7 : vector<8x48xf32>
    %12 = arith.select %9, %7, %11 : vector<8x48xi1>, vector<8x48xf32>
    %c0_7 = arith.constant 0 : index
    %c0_8 = arith.constant 0 : index
    %13 = vector.load %arg4[%c0_7, %c0_8] : memref<48x48xf32, #tpu.memory_space<vmem>>, vector<48x48xf32>
    %cst_9 = arith.constant dense<0.000000e+00> : vector<8x48xf32>
    %14 = tpu.matmul %12, %13, %cst_9 {dimension_numbers = #tpu.dot_dimension_numbers<[1], [0], [0], [1], [0, 0, 1, 1], [], []>} : vector<8x48xf32>, vector<48x48xf32>, vector<8x48xf32> -> vector<8x48xf32>
    %c0_10 = arith.constant 0 : index
    %c0_11 = arith.constant 0 : index
    %15 = vector.load %arg5[%c0_10, %c0_11] : memref<1x48xf32, #tpu.memory_space<vmem>>, vector<1x48xf32>
    %16 = vector.broadcast %15 : vector<1x48xf32> to vector<8x48xf32>
    %17 = arith.addf %14, %16 : vector<8x48xf32>
    %cst_12 = arith.constant 0.000000e+00 : f32
    %18 = vector.broadcast %cst_12 : f32 to vector<8x48xf32>
    %19 = arith.cmpf ogt, %17, %18 : vector<8x48xf32>
    %cst_13 = arith.constant 2.000000e-01 : f32
    %20 = vector.broadcast %cst_13 : f32 to vector<8x48xf32>
    %21 = arith.mulf %20, %17 : vector<8x48xf32>
    %22 = arith.select %19, %17, %21 : vector<8x48xi1>, vector<8x48xf32>
    %c0_14 = arith.constant 0 : index
    %c0_15 = arith.constant 0 : index
    %23 = vector.load %arg6[%c0_14, %c0_15] : memref<48x48xf32, #tpu.memory_space<vmem>>, vector<48x48xf32>
    %cst_16 = arith.constant dense<0.000000e+00> : vector<8x48xf32>
    %24 = tpu.matmul %22, %23, %cst_16 {dimension_numbers = #tpu.dot_dimension_numbers<[1], [0], [0], [1], [0, 0, 1, 1], [], []>} : vector<8x48xf32>, vector<48x48xf32>, vector<8x48xf32> -> vector<8x48xf32>
    %c0_17 = arith.constant 0 : index
    %c0_18 = arith.constant 0 : index
    %25 = vector.load %arg7[%c0_17, %c0_18] : memref<1x48xf32, #tpu.memory_space<vmem>>, vector<1x48xf32>
    %26 = vector.broadcast %25 : vector<1x48xf32> to vector<8x48xf32>
    %27 = arith.addf %24, %26 : vector<8x48xf32>
    %cst_19 = arith.constant 0.000000e+00 : f32
    %28 = vector.broadcast %cst_19 : f32 to vector<8x48xf32>
    %29 = arith.cmpf ogt, %27, %28 : vector<8x48xf32>
    %cst_20 = arith.constant 2.000000e-01 : f32
    %30 = vector.broadcast %cst_20 : f32 to vector<8x48xf32>
    %31 = arith.mulf %30, %27 : vector<8x48xf32>
    %32 = arith.select %29, %27, %31 : vector<8x48xi1>, vector<8x48xf32>
    %c0_21 = arith.constant 0 : index
    %c0_22 = arith.constant 0 : index
    %33 = vector.load %arg8[%c0_21, %c0_22] : memref<48x8xf32, #tpu.memory_space<vmem>>, vector<48x8xf32>
    %cst_23 = arith.constant dense<0.000000e+00> : vector<8x8xf32>
    %34 = tpu.matmul %32, %33, %cst_23 {dimension_numbers = #tpu.dot_dimension_numbers<[1], [0], [0], [1], [0, 0, 1, 1], [], []>} : vector<8x48xf32>, vector<48x8xf32>, vector<8x8xf32> -> vector<8x8xf32>
    %c0_24 = arith.constant 0 : index
    %c0_25 = arith.constant 0 : index
    %35 = vector.load %arg9[%c0_24, %c0_25] : memref<1x8xf32, #tpu.memory_space<vmem>>, vector<1x8xf32>
    %36 = vector.broadcast %35 : vector<1x8xf32> to vector<8x8xf32>
    %37 = arith.addf %34, %36 : vector<8x8xf32>
    %38 = vector.extract_strided_slice %37 {offsets = [0, 0], sizes = [8, 4], strides = [1, 1]} : vector<8x8xf32> to vector<8x4xf32>
    %39 = vector.extract_strided_slice %37 {offsets = [0, 4], sizes = [8, 4], strides = [1, 1]} : vector<8x8xf32> to vector<8x4xf32>
    %c0_26 = arith.constant 0 : index
    %c0_27 = arith.constant 0 : index
    %40 = vector.load %arg10[%c0_26, %c0_27] : memref<1x4xf32, #tpu.memory_space<vmem>>, vector<1x4xf32>
    %41 = vector.broadcast %40 : vector<1x4xf32> to vector<8x4xf32>
    %42 = arith.mulf %41, %1 : vector<8x4xf32>
    %c0_28 = arith.constant 0 : index
    %c0_29 = arith.constant 0 : index
    %43 = vector.load %arg11[%c0_28, %c0_29] : memref<1x4xf32, #tpu.memory_space<vmem>>, vector<1x4xf32>
    %44 = vector.broadcast %43 : vector<1x4xf32> to vector<8x4xf32>
    %45 = arith.addf %42, %44 : vector<8x4xf32>
    %46 = math.exp %38 : vector<8x4xf32>
    %47 = arith.mulf %46, %2 : vector<8x4xf32>
    %48 = arith.addf %47, %39 : vector<8x4xf32>
    %49 = tpu.concatenate %45, %48 in 1 : vector<8x4xf32>, vector<8x4xf32> -> vector<8x8xf32>
    %c0_30 = arith.constant 0 : index
    %c0_31 = arith.constant 0 : index
    %50 = vector.load %arg13[%c0_30, %c0_31] : memref<8x8xf32, #tpu.memory_space<vmem>>, vector<8x8xf32>
    tpu.vector_store %arg13[%c0_30, %c0_31], %49 {strides = array<i32>} : memref<8x8xf32, #tpu.memory_space<vmem>>, vector<8x8xf32>,
    %cst_32 = arith.constant dense<0.000000e+00> : vector<8xf32>
    %51 = vector.multi_reduction <add>, %38, %cst_32 [1] : vector<8x4xf32> to vector<8xf32>
    %52 = vector.shape_cast %51 : vector<8xf32> to vector<8x1xf32>
    %c0_33 = arith.constant 0 : index
    %c0_34 = arith.constant 0 : index
    %53 = vector.load %arg12[%c0_33, %c0_34] : memref<1x1xf32, #tpu.memory_space<vmem>>, vector<1x1xf32>
    %54 = vector.broadcast %53 : vector<1x1xf32> to vector<8x1xf32>
    %55 = arith.addf %52, %54 : vector<8x1xf32>
    %c0_35 = arith.constant 0 : index
    %c0_36 = arith.constant 0 : index
    %56 = vector.load %arg14[%c0_35, %c0_36] : memref<8x1xf32, #tpu.memory_space<vmem>>, vector<8x1xf32>
    tpu.vector_store %arg14[%c0_35, %c0_36], %55 {strides = array<i32>} : memref<8x1xf32, #tpu.memory_space<vmem>>, vector<8x1xf32>,
    return
  }
  func.func @transform_0(%arg0: i32) -> (i32, i32) {
    %c0_i32 = arith.constant 0 : i32
    %c0_i32_0 = arith.constant 0 : i32
    return %arg0, %c0_i32 : i32, i32
  }
  func.func @transform_1(%arg0: i32) -> (i32, i32) {
    %c0_i32 = arith.constant 0 : i32
    %c0_i32_0 = arith.constant 0 : i32
    %c0_i32_1 = arith.constant 0 : i32
    return %c0_i32, %c0_i32_0 : i32, i32
  }
  func.func @transform_2(%arg0: i32) -> (i32, i32) {
    %c0_i32 = arith.constant 0 : i32
    %c0_i32_0 = arith.constant 0 : i32
    %c0_i32_1 = arith.constant 0 : i32
    return %c0_i32, %c0_i32_0 : i32, i32
  }
  func.func @transform_3(%arg0: i32) -> (i32, i32) {
    %c0_i32 = arith.constant 0 : i32
    %c0_i32_0 = arith.constant 0 : i32
    %c0_i32_1 = arith.constant 0 : i32
    return %c0_i32, %c0_i32_0 : i32, i32
  }
  func.func @transform_4(%arg0: i32) -> (i32, i32) {
    %c0_i32 = arith.constant 0 : i32
    %c0_i32_0 = arith.constant 0 : i32
    %c0_i32_1 = arith.constant 0 : i32
    return %c0_i32, %c0_i32_0 : i32, i32
  }
  func.func @transform_5(%arg0: i32) -> (i32, i32) {
    %c0_i32 = arith.constant 0 : i32
    %c0_i32_0 = arith.constant 0 : i32
    %c0_i32_1 = arith.constant 0 : i32
    return %c0_i32, %c0_i32_0 : i32, i32
  }
  func.func @transform_6(%arg0: i32) -> (i32, i32) {
    %c0_i32 = arith.constant 0 : i32
    %c0_i32_0 = arith.constant 0 : i32
    %c0_i32_1 = arith.constant 0 : i32
    return %c0_i32, %c0_i32_0 : i32, i32
  }
  func.func @transform_7(%arg0: i32) -> (i32, i32) {
    %c0_i32 = arith.constant 0 : i32
    %c0_i32_0 = arith.constant 0 : i32
    %c0_i32_1 = arith.constant 0 : i32
    return %c0_i32, %c0_i32_0 : i32, i32
  }
  func.func @transform_8(%arg0: i32) -> (i32, i32) {
    %c0_i32 = arith.constant 0 : i32
    %c0_i32_0 = arith.constant 0 : i32
    %c0_i32_1 = arith.constant 0 : i32
    return %c0_i32, %c0_i32_0 : i32, i32
  }
  func.func @transform_9(%arg0: i32) -> (i32, i32) {
    %c0_i32 = arith.constant 0 : i32
    %c0_i32_0 = arith.constant 0 : i32
    %c0_i32_1 = arith.constant 0 : i32
    return %c0_i32, %c0_i32_0 : i32, i32
  }
  func.func @transform_10(%arg0: i32) -> (i32, i32) {
    %c0_i32 = arith.constant 0 : i32
    %c0_i32_0 = arith.constant 0 : i32
    %c0_i32_1 = arith.constant 0 : i32
    return %c0_i32, %c0_i32_0 : i32, i32
  }
  func.func @transform_11(%arg0: i32) -> (i32, i32) {
    %c0_i32 = arith.constant 0 : i32
    %c0_i32_0 = arith.constant 0 : i32
    %c0_i32_1 = arith.constant 0 : i32
    return %c0_i32, %c0_i32_0 : i32, i32
  }
  func.func @transform_12(%arg0: i32) -> (i32, i32) {
    %c0_i32 = arith.constant 0 : i32
    %c0_i32_0 = arith.constant 0 : i32
    return %arg0, %c0_i32 : i32, i32
  }
  func.func @transform_13(%arg0: i32) -> (i32, i32) {
    %c0_i32 = arith.constant 0 : i32
    %c0_i32_0 = arith.constant 0 : i32
    return %arg0, %c0_i32 : i32, i32
  }
}

</mosaic_0001>

<bundles_post_ra>
// kernel: tpu_custom_call.1
= control target key start
LH: loop header
LB: loop body
LE: loop exit
PB: predicated region body
PF: predicated region fallthrough
CT: control target
= control target key end

     0   :  { %s836_s0 = inlined_call_operand.vmem [shape: f32[8,8], index: 0, kind: input, shape index: {}]   ;;  %s837_s1 = inlined_call_operand.vmem [shape: f32[4,48], index: 1, kind: input, shape index: {}]   ;;  %s838_s2 = inlined_call_operand.vmem [shape: f32[1,48], index: 2, kind: input, shape index: {}]   ;;  %s839_s3 = inlined_call_operand.vmem [shape: f32[48,48], index: 3, kind: input, shape index: {}]   ;;  %s840_s4 = inlined_call_operand.vmem [shape: f32[1,48], index: 4, kind: input, shape index: {}]   ;;  %s841_s5 = inlined_call_operand.hbm [shape: f32[48,48], index: 5, kind: input, shape index: {}]   ;;  %s842_s6 = inlined_call_operand.vmem [shape: f32[1,48], index: 6, kind: input, shape index: {}]   ;;  %s843_s7 = inlined_call_operand.vmem [shape: f32[48,8], index: 7, kind: input, shape index: {}]   ;;  %s844_s8 = inlined_call_operand.vmem [shape: f32[1,8], index: 8, kind: input, shape index: {}]   ;;  %s845_s9 = inlined_call_operand.vmem [shape: f32[1,4], index: 9, kind: input, shape index: {}]   ;;  %s846_s10 = inlined_call_operand.vmem [shape: f32[1,4], index: 10, kind: input, shape index: {}]   ;;  %s847_s11 = inlined_call_operand.<no memory space> [shape: f32[1,1], index: 11, kind: input, shape index: {}]   ;;  %s848_s12 = inlined_call_operand.hbm [shape: f32[8,8], index: 12, kind: output, shape index: {0}]   ;;  %s849_s13 = inlined_call_operand.vmem [shape: f32[8,1], index: 13, kind: output, shape index: {1}]  }
   0x1   :  { %v19_v0 = vstv %s847_s11 }
   0x2   :  { %20 = vst [vmem:[#allocation2] sm:$0x1] %v19_v0 }
   0x3   :  { %21 = vsyncpa [#allocation4], 0 }
   0x4   :  { %22 = vsyncpa [#allocation5], 0  ;;  %s652_s27 = smov [#allocation3]   ;;  %s604_s14 = scalar_lea.hbm %s841_s5, 768 }
   0x5   :  { %s38_s28 = sshll.u32 %s652_s27, 4  ;;  %p605_p0 = scmp.ne.s32.totalorder %s841_s5, %s604_s14  ;;  %s39_s28 = int_to_ptr.vmem [resolvable:$true] %s38_s28 }
   0x6   :  { %p608_p1 = scmp.lt.u32.totalorder %s604_s14, %s841_s5 }
   0x8   :  { %p610_p2 = pnand %p608_p1, %p605_p0 }
   0xa   :  { %613 = shalt.err (!%p610_p2)
}
   0xb   :  { %s614_s11 = scalar_lea.vmem %s39_s28, 768  ;;  %p619_p4 = scmp.lt.s32.totalorder %s39_s28, %s39_s28 }
   0xc   :  { %p615_p3 = scmp.ne.s32.totalorder %s39_s28, %s614_s11  ;;  %p620_p5 = scmp.lt.s32.totalorder %s614_s11, %s614_s11 }
   0xe   :  { %p621_p6 = por %p620_p5, %p619_p4 }
  0x10   :  { %p622_p7 = pnand %p621_p6, %p615_p3 }
  0x12   :  { %625 = shalt.err (!%p622_p7)
}
  0x13   :  { %s653_s19 = smov 128   ;;  %s654_s20 = smov 8  }
  0x14   :  { %44 = dma.hbm_to_vmem [thread:$0]  %s841_s5, 768, %s39_s28, [#allocation4], %s653_s19, %s653_s19, %s654_s20  }
  0x15   :  { %648 = dma.done.wait [#allocation4], 768  }
  0x16   :  { %649 = vsyncadd [#allocation4], 4294966528  ;;  %v655_v1 = vmov 0.0   ;;  %vm656_vm0 = vmmov 0   ;;  %v657_v2 = vmov 0.0|0.0   ;;  %vm73_vm1 = vcmask 1043456  }
  0x17   :  { %516 = vmatprep.subr.mxu0 %v655_v1  ;;  %518 = vmatprep.mubr.msk.f32.mxu0 %vm656_vm0, %v655_v1  ;;  %vm69_vm2 = vcmask 31744   ;;  %v61_v3 = vld [vmem:[%s837_s1] sm:$0xf]  ;;  %v151_v6 = vld [vmem:[%s839_s3 + $0x8] sm:$0xff]  ;;  %v152_v7 = vld [vmem:[%s839_s3 + $0x10] sm:$0xff]  ;;  %vm163_vm4 = vcmask 392192  }
  0x18   :  { %566 = vmatprep.subr.bf16.mxu1 %v657_v2  ;;  %533 = vmatprep.mubr.msk.f32.mxu1 %vm656_vm0, %v655_v1  ;;  %v754_v4 = vld [vmem:[%s836_s0] sm:$0xff]  ;;  %v153_v9 = vld [vmem:[%s839_s3 + $0x18] sm:$0xff]  ;;  %v155_v12 = vld [vmem:[%s839_s3 + $0x28] sm:$0xff]  ;;  %s658_s14 = smov 124   ;;  %vm460_vm7 = vcmask 7168   ;;  %s660_s19 = smov [#allocation6]  }
  0x19   :  { %517 = vmatpush3.msk.msra.mxu0 %vm73_vm1, %v61_v3  ;;  %v150_v5 = vld [vmem:[%s839_s3] sm:$0xff]  ;;  %v570_v10 = vpack.c.bf16 %v153_v9, %v152_v7  ;;  %v241_v15 = vld [vmem:[#allocation3 + $0x8] sm:$0xff]  ;;  %v242_v16 = vld [vmem:[#allocation3 + $0x10] sm:$0xff]  ;;  %433 = vrot.lane.b32.xlu0 %v754_v4, %s658_s14  ;;  %vm447_vm8 = vcmask 64512  }
  0x1a   :  { %519 = vmatmul.mubr.msk.f32.vlgmr.msra.gmra.mrb[0].mxu0 %vm69_vm2, %v754_v4  ;;  %v567_v8 = vpack.c.bf16 %v151_v6, %v150_v5  ;;  %575 = vmatprep.subr.bf16.mxu0 %v657_v2  ;;  %v154_v11 = vld [vmem:[%s839_s3 + $0x20] sm:$0xff]  ;;  %v245_v27 = vld [vmem:[#allocation3 + $0x28] sm:$0xff]  ;;  %v332_v33 = vld [vmem:[%s843_s7 + $0x18] sm:$0xff]  ;;  %s468_s3 = sshll.u32 %s660_s19, 4  ;;  %s469_s3 = int_to_ptr.vmem [resolvable:$true] %s468_s3 }
  0x1b   :  { %548 = vmatprep.mubr.msk.f32.mxu0 %vm656_vm0, %v655_v1  ;;  %v573_v13 = vpack.c.bf16 %v155_v12, %v154_v11  ;;  %v240_v14 = vld [vmem:[#allocation3] sm:$0xff]  ;;  %v243_v18 = vld [vmem:[#allocation3 + $0x18] sm:$0xff]  ;;  %v331_v31 = vld [vmem:[%s843_s7 + $0x10] sm:$0xff]  ;;  %p631_p9 = scmp.lt.s32.totalorder %s469_s3, %s469_s3 }
  0x1c   :  { %568 = vmatpush3.bf16.msra.mxu1 %v567_v8  ;;  %v576_v17 = vpack.c.bf16 %v241_v15, %v240_v14  ;;  %v579_v19 = vpack.c.bf16 %v243_v18, %v242_v16  ;;  %v481_v20 = vld [vmem:[%s838_s2] ss:$0 sm:$0xff]  ;;  %v244_v26 = vld [vmem:[#allocation3 + $0x20] sm:$0xff]  ;;  %v588_v34 = vpack.c.bf16 %v332_v33, %v331_v31 }
  0x1d   :  { %569 = vmatprep.subr.bf16.mxu1 %v657_v2  ;;  %v582_v28 = vpack.c.bf16 %v245_v27, %v244_v26  ;;  %v329_v29 = vld [vmem:[%s843_s7] sm:$0xff]  ;;  %v330_v30 = vld [vmem:[%s843_s7 + $0x8] sm:$0xff] }
  0x1e   :  { %577 = vmatpush3.bf16.msra.mxu0 %v576_v17  ;;  %v585_v32 = vpack.c.bf16 %v330_v30, %v329_v29  ;;  %v484_v35 = vld [vmem:[%s840_s4] ss:$0 sm:$0xff]  ;;  %v334_v42 = vld [vmem:[%s843_s7 + $0x28] sm:$0xff] }
  0x1f   :  { %578 = vmatprep.subr.bf16.mxu0 %v657_v2  ;;  %v333_v41 = vld [vmem:[%s843_s7 + $0x20] sm:$0xff] }
  0x20   :  { %571 = vmatpush3.bf16.msra.mxu1 %v570_v10  ;;  %v591_v43 = vpack.c.bf16 %v334_v42, %v333_v41  ;;  %v486_v44 = vld [vmem:[%s842_s6] ss:$0 sm:$0xff]  ;;  %s659_s6 = smov 4  }
  0x21   :  { %572 = vmatprep.subr.bf16.mxu1 %v657_v2  ;;  %v488_v50 = vld [vmem:[%s844_s8] ss:$0 sm:$0xff] }
  0x22   :  { %580 = vmatpush3.bf16.msra.mxu0 %v579_v19  ;;  %v492_v61 = vld [vmem:[#allocation2] ss:$0 sm:$0xff] }
  0x23   :  { %581 = vmatprep.subr.bf16.mxu0 %v657_v2  ;;  %v490_v0 = vld [vmem:[%s845_s9] ss:$0 sm:$0xff] }
  0x24   :  { %574 = vmatpush3.bf16.msra.mxu1 %v573_v13 }
  0x25   :  { %584 = vmatprep.subr.bf16.mxu1 %v657_v2 }
  0x26   :  { %583 = vmatpush3.bf16.msra.mxu0 %v582_v28 }
  0x8b   :  { %v434_v57 = vpop.permute.xlu0 %433 }
  0xed   :  { %v143_v21 = vpop.f32.mrb[0].mxu0 }
  0xee   :  { %v144_v22 = vadd.f32 %v481_v20, %v143_v21  ;;  %v520_v23 = vpop.f32.mrb[1].mxu0 }
  0xf0   :  { %vm147_vm3 = vcmp.gt.f32.partialorder %v144_v22, 0.0  ;;  %v148_v24 = vmul.f32 0.2, %v144_v22 }
  0xf2   :  { %v149_v25 = vsel %vm147_vm3, %v144_v22, %v148_v24 }
  0xf3   :  { %534 = vmatmul.mubr.msk.f32.vlgmr.msra.gmra.mrb[0].mxu1 %vm163_vm4, %v149_v25 }
  0xf4   :  { %563 = vmatprep.mubr.msk.f32.mxu1 %vm656_vm0, %v655_v1  ;;  %586 = vmatpush3.bf16.msra.mxu1 %v585_v32  ;;  %v422_v1 = vmul.f32 %v490_v0, %v754_v4 }
  0xf5   :  { %587 = vmatprep.subr.bf16.mxu1 %v657_v2 }
  0xf8   :  { %589 = vmatpush3.bf16.msra.mxu1 %v588_v34 }
  0xf9   :  { %590 = vmatprep.subr.bf16.mxu1 %v657_v2  ;;  %v491_v2 = vld [vmem:[%s846_s10] ss:$0 sm:$0xff] }
  0xfa   :  { %v430_v3 = vadd.f32 %v491_v2, %v422_v1 }
  0xfc   :  { %592 = vmatpush3.bf16.msra.mxu1 %v591_v43 }
 0x1c6   :  { %v233_v36 = vpop.f32.mrb[0].mxu1 }
 0x1c7   :  { %v234_v37 = vadd.f32 %v484_v35, %v233_v36  ;;  %v535_v38 = vpop.f32.mrb[1].mxu1 }
 0x1c9   :  { %vm237_vm5 = vcmp.gt.f32.partialorder %v234_v37, 0.0  ;;  %v238_v39 = vmul.f32 0.2, %v234_v37 }
 0x1cb   :  { %v239_v40 = vsel %vm237_vm5, %v234_v37, %v238_v39 }
 0x1cc   :  { %549 = vmatmul.mubr.msk.f32.vlgmr.msra.gmra.mrb[2].mxu0 %vm163_vm4, %v239_v40 }
 0x29f   :  { %v322_v45 = vpop.f32.mrb[2].mxu0 }
 0x2a0   :  { %v323_v46 = vadd.f32 %v486_v44, %v322_v45  ;;  %v550_v47 = vpop.f32.mrb[3].mxu0 }
 0x2a2   :  { %vm326_vm6 = vcmp.gt.f32.partialorder %v323_v46, 0.0  ;;  %v327_v48 = vmul.f32 0.2, %v323_v46 }
 0x2a4   :  { %v328_v49 = vsel %vm326_vm6, %v323_v46, %v327_v48 }
 0x2a5   :  { %564 = vmatmul.mubr.msk.f32.vlgmr.msra.gmra.mrb[2].mxu1 %vm163_vm4, %v328_v49 }
 0x378   :  { %v411_v51 = vpop.f32.mrb[2].mxu1 }
 0x379   :  { %v412_v52 = vadd.f32 %v488_v50, %v411_v51  ;;  %v565_v53 = vpop.f32.mrb[3].mxu1 }
 0x37b   :  { %438 = vrot.lane.b32.xlu0 %v412_v52, %s658_s14  ;;  %v449_v54 = vsel %vm69_vm2, %v412_v52, 0.0  ;;  %v431_v55 = vmul.f32 1.442695, %v412_v52 }
 0x37c   :  { %450 = vadd.xlane.f32.xlu1 %v449_v54 }
 0x37d   :  { %602 = vpow2.f32 %v431_v55 }
 0x387   :  { %v603_v56 = vpop.eup %602 }
 0x388   :  { %v436_v58 = vmul.f32 %v603_v56, %v434_v57 }
 0x3ed   :  { %v439_v59 = vpop.permute.xlu0 %438 }
 0x3ee   :  { %v441_v60 = vadd.f32 %v439_v59, %v436_v58 }
 0x3f0   :  { %443 = vrot.lane.b32.xlu1 %v441_v60, %s659_s6 }
 0x409   :  { %v451_v62 = vpop.xlane.xlu1 %450 }
 0x40a   :  { %v459_v63 = vadd.f32 %v492_v61, %v451_v62 }
 0x40c   :  { %461 = vst.msk [vmem:[%s849_s13] sm:$0xff] %vm460_vm7, %v459_v63  ;;  %s626_s13 = scalar_lea.vmem %s469_s3, 128 }
 0x40d   :  { %p627_p8 = scmp.ne.s32.totalorder %s469_s3, %s626_s13  ;;  %p632_p10 = scmp.lt.s32.totalorder %s626_s13, %s626_s13 }
 0x40f   :  { %p633_p11 = por %p632_p10, %p631_p9 }
 0x411   :  { %p634_p12 = pnand %p633_p11, %p627_p8 }
 0x462   :  { %v444_v5 = vpop.permute.xlu1 %443 }
 0x463   :  { %v446_v6 = vsel %vm69_vm2, %v430_v3, %v444_v5 }
 0x464   :  { %448 = vst.msk [vmem:[#allocation6] sm:$0xff] %vm447_vm8, %v446_v6 }
 0x465   :  { %637 = shalt.err (!%p634_p12)
}
 0x466   :  { %s638_s10 = scalar_lea.hbm %s848_s12, 128 }
 0x467   :  { %p639_p13 = scmp.ne.s32.totalorder %s848_s12, %s638_s10  ;;  %p642_p0 = scmp.lt.u32.totalorder %s638_s10, %s848_s12 }
 0x469   :  { %p644_p1 = pnand %p642_p0, %p639_p13 }
 0x46b   :  { %647 = shalt.err (!%p644_p1)
}
 0x46c   :  { %471 = dma.vmem_to_hbm [thread:$0]  %s469_s3, 128, %s848_s12, [#allocation5]  }
 0x46d   :  { %650 = dma.done.wait [#allocation5], 128  }
 0x46e   :  { %651 = vsyncadd [#allocation5], 4294967168 }
 0x46f   :  { %479 = vsyncpa [#allocation4], 1 }
 0x470   :  { %480 = vsyncpa [#allocation5], 1 }

</bundles_post_ra>
